<compile_context>
chip_gen: v5e
topology: v5e:2x2
jax: 0.10.0
libtpu: 0.0.40
codegen_flags: <defaults>
</compile_context>

<pallas_src>
import jax
import jax.numpy as jnp
from jax.experimental import pallas as pl
from jax.experimental.pallas import tpu as pltpu


def critic_kernel(s_ref, a_ref, w1s_ref, w1a_ref, b1_ref,
                  w2_ref, b2_ref, w3_ref, b3_ref, q_ref):
    # Upcast the resident bf16 weights once per grid step (weights are VMEM-resident
    # across the whole grid thanks to the constant index_maps; converts are tiny).
    w1s = w1s_ref[...].astype(jnp.float32)          # (in_dims, fc1_p)
    w1a = w1a_ref[...].astype(jnp.float32)          # (n_act,   fc1_p)
    w2 = w2_ref[...].astype(jnp.float32)            # (fc1_p,   fc2_p)
    w3 = w3_ref[...].astype(jnp.float32)            # (1,       fc2_p) -- last layer as a row

    # Layer 1: split matmul replaces torch.cat([state, action], dim=1).
    h1 = (jnp.dot(s_ref[...], w1s, preferred_element_type=jnp.float32)
          + jnp.dot(a_ref[...], w1a, preferred_element_type=jnp.float32)
          + b1_ref[...])
    h1 = jnp.maximum(h1, 0.0)                       # relu (f32 on the VPU)

    # Layer 2.
    h2 = jnp.dot(h1, w2, preferred_element_type=jnp.float32) + b2_ref[...]
    h2 = jnp.maximum(h2, 0.0)

    # Layer 3 (out_features = 1): VPU multiply + XLU row-reduce instead of a
    # 1-lane-useful MXU matmul (keeps the MXU result path free).
    q = jnp.sum(h2 * w3, axis=-1, keepdims=True) + b3_ref[...]
    q_ref[...] = q.astype(q_ref.dtype)              # (BLOCK_B, 1)


def critic_forward(state, action, params, *, block_b=128):
    """Pallas wrapper. state: (B, input_dims) f32, action: (B, n_actions) f32."""
    w1s, w1a, b1, w2, b2, w3, b3 = params
    B, in_dims = state.shape
    n_act = action.shape[1]
    fc1_p = w1s.shape[1]
    fc2_p = w2.shape[1]

    batch_map = lambda i: (i, 0)     # tiles marching down the batch axis
    const_map = lambda i: (0, 0)     # weights/biases resident across all grid steps

    flops = 2 * B * (in_dims * fc1_p + n_act * fc1_p + fc1_p * fc2_p + fc2_p)
    bytes_accessed = (
        state.size * 4 + action.size * 4 + B * 4                 # f32 activations + output
        + (w1s.size + w1a.size + w2.size + w3.size) * 2          # bf16 weights
        + (b1.size + b2.size + b3.size) * 4                      # f32 biases
    )

    return pl.pallas_call(
        critic_kernel,
        out_shape=jax.ShapeDtypeStruct((B, 1), jnp.float32),
        grid=(pl.cdiv(B, block_b),),
        in_specs=[
            pl.BlockSpec((block_b, in_dims), batch_map),
            pl.BlockSpec((block_b, n_act), batch_map),
            pl.BlockSpec(w1s.shape, const_map),
            pl.BlockSpec(w1a.shape, const_map),
            pl.BlockSpec(b1.shape, const_map),
            pl.BlockSpec(w2.shape, const_map),
            pl.BlockSpec(b2.shape, const_map),
            pl.BlockSpec(w3.shape, const_map),
            pl.BlockSpec(b3.shape, const_map),
        ],
        out_specs=pl.BlockSpec((block_b, 1), batch_map),
        compiler_params=pltpu.CompilerParams(
            dimension_semantics=("parallel",)),
        cost_estimate=pl.CostEstimate(
            flops=flops, transcendentals=0, bytes_accessed=bytes_accessed),
    )(state, action, w1s, w1a, b1, w2, b2, w3, b3)


def init_critic_params(key, input_dims, n_actions, fc1_dims, fc2_dims,
                       *, pad_to=128, weight_dtype=jnp.bfloat16):
    """Torch-style +-1/sqrt(fan_in) init. Weights stored (in_features, out_features).

    Hidden dims are zero-padded to `pad_to` multiples (MXU/lane friendly). Padded hidden
    units have zero weight AND zero bias, so relu(0)=0 contributes nothing downstream:
    the padded network is exactly equivalent to the unpadded one.
    """
    d_in = input_dims + n_actions
    ks = jax.random.split(key, 6)

    def lin(kw, kb, fan_in, fan_out):
        bound = float(fan_in) ** -0.5
        w = jax.random.uniform(kw, (fan_in, fan_out), jnp.float32, -bound, bound)
        b = jax.random.uniform(kb, (1, fan_out), jnp.float32, -bound, bound)
        return w, b

    w1, b1 = lin(ks[0], ks[1], d_in, fc1_dims)
    w2, b2 = lin(ks[2], ks[3], fc1_dims, fc2_dims)
    w3, b3 = lin(ks[4], ks[5], fc2_dims, 1)

    rup = lambda n, m: ((n + m - 1) // m) * m
    fc1_p = rup(fc1_dims, pad_to)
    fc2_p = rup(fc2_dims, pad_to)

    w1 = jnp.pad(w1, ((0, 0), (0, fc1_p - fc1_dims)))
    b1 = jnp.pad(b1, ((0, 0), (0, fc1_p - fc1_dims)))
    w2 = jnp.pad(w2, ((0, fc1_p - fc1_dims), (0, fc2_p - fc2_dims)))
    b2 = jnp.pad(b2, ((0, 0), (0, fc2_p - fc2_dims)))
    w3 = jnp.pad(w3, ((0, fc2_p - fc2_dims), (0, 0)))

    # Split w1 so the kernel never needs cat([state, action]); store last layer as a row.
    w1s = w1[:input_dims]
    w1a = w1[input_dims:]
    w3_row = w3.T                                   # (1, fc2_p)

    # bf16 weights halve HBM weight traffic; biases stay f32 (accumulation is f32).
    wd = weight_dtype
    return (w1s.astype(wd), w1a.astype(wd), b1,
            w2.astype(wd), b2, w3_row.astype(wd), b3)


def critic_ref(state, action, params):
    """Pure-JAX reference (same bf16-stored weights upcast to f32, f32 math)."""
    w1s, w1a, b1, w2, b2, w3_row, b3 = params
    f32 = lambda a: a.astype(jnp.float32)
    h1 = jnp.maximum(state @ f32(w1s) + action @ f32(w1a) + b1, 0.0)
    h2 = jnp.maximum(h1 @ f32(w2) + b2, 0.0)
    return h2 @ f32(w3_row).T + b3


if __name__ == "__main__":
    # Small shapes consistent with the module's forward; B is a multiple of BLOCK_B
    # so the grid has 2 steps and the "parallel" batch axis is exercised.
    B = 256
    input_dims = 8
    n_actions = 4
    fc1_dims = 32
    fc2_dims = 32

    key = jax.random.PRNGKey(0)
    k_state, k_action, k_params = jax.random.split(key, 3)

    state = jax.random.normal(k_state, (B, input_dims), jnp.float32)
    action = jax.random.normal(k_action, (B, n_actions), jnp.float32)
    params = init_critic_params(k_params, input_dims, n_actions, fc1_dims, fc2_dims)

    q = critic_forward(state, action, params)
    q = jax.block_until_ready(q)

    q_ref = critic_ref(state, action, params)
    assert q.shape == (B, 1), q.shape
    assert jnp.allclose(q, q_ref, atol=1e-4, rtol=1e-4), (q[:4], q_ref[:4])

    print("KERNEL_OK")
</pallas_src>

<mosaic_0001>
module attributes {stable_mosaic.version = 11 : i64} {
  func.func @critic_kernel(%arg0: i32, %arg1: memref<128x8xf32, #tpu.memory_space<vmem>>, %arg2: memref<128x4xf32, #tpu.memory_space<vmem>>, %arg3: memref<8x128xbf16, #tpu.memory_space<vmem>>, %arg4: memref<4x128xbf16, #tpu.memory_space<vmem>>, %arg5: memref<1x128xf32, #tpu.memory_space<vmem>>, %arg6: memref<128x128xbf16, #tpu.memory_space<vmem>>, %arg7: memref<1x128xf32, #tpu.memory_space<vmem>>, %arg8: memref<1x128xbf16, #tpu.memory_space<vmem>>, %arg9: memref<1x1xf32, #tpu.memory_space<vmem>>, %arg10: memref<128x1xf32, #tpu.memory_space<vmem>>) attributes {dimension_semantics = [#tpu.dimension_semantics<parallel>], iteration_bounds = array<i64: 2>, scalar_prefetch = 0 : i64, scratch_operands = 0 : i64, tpu.core_type = #tpu.core_type<tc>, window_params = [{transform_indices = @transform_0, window_bounds = array<i64: 128, 8>}, {transform_indices = @transform_1, window_bounds = array<i64: 128, 4>}, {pipeline_mode = #tpu.pipeline_mode<synchronous>, transform_indices = @transform_2, window_bounds = array<i64: 8, 128>}, {pipeline_mode = #tpu.pipeline_mode<synchronous>, transform_indices = @transform_3, window_bounds = array<i64: 4, 128>}, {pipeline_mode = #tpu.pipeline_mode<synchronous>, transform_indices = @transform_4, window_bounds = array<i64: 1, 128>}, {pipeline_mode = #tpu.pipeline_mode<synchronous>, transform_indices = @transform_5, window_bounds = array<i64: 128, 128>}, {pipeline_mode = #tpu.pipeline_mode<synchronous>, transform_indices = @transform_6, window_bounds = array<i64: 1, 128>}, {pipeline_mode = #tpu.pipeline_mode<synchronous>, transform_indices = @transform_7, window_bounds = array<i64: 1, 128>}, {pipeline_mode = #tpu.pipeline_mode<synchronous>, transform_indices = @transform_8, window_bounds = array<i64: 1, 1>}, {transform_indices = @transform_9, window_bounds = array<i64: 128, 1>}]} {
    %c0 = arith.constant 0 : index
    %c0_0 = arith.constant 0 : index
    %0 = vector.load %arg3[%c0, %c0_0] : memref<8x128xbf16, #tpu.memory_space<vmem>>, vector<8x128xbf16>
    %1 = arith.extf %0 : vector<8x128xbf16> to vector<8x128xf32>
    %c0_1 = arith.constant 0 : index
    %c0_2 = arith.constant 0 : index
    %2 = vector.load %arg4[%c0_1, %c0_2] : memref<4x128xbf16, #tpu.memory_space<vmem>>, vector<4x128xbf16>
    %3 = arith.extf %2 : vector<4x128xbf16> to vector<4x128xf32>
    %c0_3 = arith.constant 0 : index
    %c0_4 = arith.constant 0 : index
    %4 = vector.load %arg6[%c0_3, %c0_4] : memref<128x128xbf16, #tpu.memory_space<vmem>>, vector<128x128xbf16>
    %5 = arith.extf %4 : vector<128x128xbf16> to vector<128x128xf32>
    %c0_5 = arith.constant 0 : index
    %c0_6 = arith.constant 0 : index
    %6 = vector.load %arg8[%c0_5, %c0_6] : memref<1x128xbf16, #tpu.memory_space<vmem>>, vector<1x128xbf16>
    %7 = arith.extf %6 : vector<1x128xbf16> to vector<1x128xf32>
    %c0_7 = arith.constant 0 : index
    %c0_8 = arith.constant 0 : index
    %8 = vector.load %arg1[%c0_7, %c0_8] : memref<128x8xf32, #tpu.memory_space<vmem>>, vector<128x8xf32>
    %cst = arith.constant dense<0.000000e+00> : vector<128x128xf32>
    %9 = tpu.matmul %8, %1, %cst {dimension_numbers = #tpu.dot_dimension_numbers<[1], [0], [0], [1], [0, 0, 1, 1], [], []>} : vector<128x8xf32>, vector<8x128xf32>, vector<128x128xf32> -> vector<128x128xf32>
    %c0_9 = arith.constant 0 : index
    %c0_10 = arith.constant 0 : index
    %10 = vector.load %arg2[%c0_9, %c0_10] : memref<128x4xf32, #tpu.memory_space<vmem>>, vector<128x4xf32>
    %cst_11 = arith.constant dense<0.000000e+00> : vector<128x128xf32>
    %11 = tpu.matmul %10, %3, %cst_11 {dimension_numbers = #tpu.dot_dimension_numbers<[1], [0], [0], [1], [0, 0, 1, 1], [], []>} : vector<128x4xf32>, vector<4x128xf32>, vector<128x128xf32> -> vector<128x128xf32>
    %12 = arith.addf %9, %11 : vector<128x128xf32>
    %c0_12 = arith.constant 0 : index
    %c0_13 = arith.constant 0 : index
    %13 = vector.load %arg5[%c0_12, %c0_13] : memref<1x128xf32, #tpu.memory_space<vmem>>, vector<1x128xf32>
    %14 = vector.broadcast %13 : vector<1x128xf32> to vector<128x128xf32>
    %15 = arith.addf %12, %14 : vector<128x128xf32>
    %cst_14 = arith.constant 0.000000e+00 : f32
    %16 = vector.broadcast %cst_14 : f32 to vector<128x128xf32>
    %17 = arith.maximumf %15, %16 : vector<128x128xf32>
    %cst_15 = arith.constant dense<0.000000e+00> : vector<128x128xf32>
    %18 = tpu.matmul %17, %5, %cst_15 {dimension_numbers = #tpu.dot_dimension_numbers<[1], [0], [0], [1], [0, 0, 1, 1], [], []>} : vector<128x128xf32>, vector<128x128xf32>, vector<128x128xf32> -> vector<128x128xf32>
    %c0_16 = arith.constant 0 : index
    %c0_17 = arith.constant 0 : index
    %19 = vector.load %arg7[%c0_16, %c0_17] : memref<1x128xf32, #tpu.memory_space<vmem>>, vector<1x128xf32>
    %20 = vector.broadcast %19 : vector<1x128xf32> to vector<128x128xf32>
    %21 = arith.addf %18, %20 : vector<128x128xf32>
    %cst_18 = arith.constant 0.000000e+00 : f32
    %22 = vector.broadcast %cst_18 : f32 to vector<128x128xf32>
    %23 = arith.maximumf %21, %22 : vector<128x128xf32>
    %24 = vector.broadcast %7 : vector<1x128xf32> to vector<128x128xf32>
    %25 = arith.mulf %23, %24 : vector<128x128xf32>
    %cst_19 = arith.constant dense<0.000000e+00> : vector<128xf32>
    %26 = vector.multi_reduction <add>, %25, %cst_19 [1] : vector<128x128xf32> to vector<128xf32>
    %27 = vector.shape_cast %26 : vector<128xf32> to vector<128x1xf32>
    %c0_20 = arith.constant 0 : index
    %c0_21 = arith.constant 0 : index
    %28 = vector.load %arg9[%c0_20, %c0_21] : memref<1x1xf32, #tpu.memory_space<vmem>>, vector<1x1xf32>
    %29 = vector.broadcast %28 : vector<1x1xf32> to vector<128x1xf32>
    %30 = arith.addf %27, %29 : vector<128x1xf32>
    %c0_22 = arith.constant 0 : index
    %c0_23 = arith.constant 0 : index
    %31 = vector.load %arg10[%c0_22, %c0_23] : memref<128x1xf32, #tpu.memory_space<vmem>>, vector<128x1xf32>
    tpu.vector_store %arg10[%c0_22, %c0_23], %30 {strides = array<i32>} : memref<128x1xf32, #tpu.memory_space<vmem>>, vector<128x1xf32>,
    return
  }
  func.func @transform_0(%arg0: i32) -> (i32, i32) {
    %c0_i32 = arith.constant 0 : i32
    %c0_i32_0 = arith.constant 0 : i32
    return %arg0, %c0_i32 : i32, i32
  }
  func.func @transform_1(%arg0: i32) -> (i32, i32) {
    %c0_i32 = arith.constant 0 : i32
    %c0_i32_0 = arith.constant 0 : i32
    return %arg0, %c0_i32 : i32, i32
  }
  func.func @transform_2(%arg0: i32) -> (i32, i32) {
    %c0_i32 = arith.constant 0 : i32
    %c0_i32_0 = arith.constant 0 : i32
    %c0_i32_1 = arith.constant 0 : i32
    return %c0_i32, %c0_i32_0 : i32, i32
  }
  func.func @transform_3(%arg0: i32) -> (i32, i32) {
    %c0_i32 = arith.constant 0 : i32
    %c0_i32_0 = arith.constant 0 : i32
    %c0_i32_1 = arith.constant 0 : i32
    return %c0_i32, %c0_i32_0 : i32, i32
  }
  func.func @transform_4(%arg0: i32) -> (i32, i32) {
    %c0_i32 = arith.constant 0 : i32
    %c0_i32_0 = arith.constant 0 : i32
    %c0_i32_1 = arith.constant 0 : i32
    return %c0_i32, %c0_i32_0 : i32, i32
  }
  func.func @transform_5(%arg0: i32) -> (i32, i32) {
    %c0_i32 = arith.constant 0 : i32
    %c0_i32_0 = arith.constant 0 : i32
    %c0_i32_1 = arith.constant 0 : i32
    return %c0_i32, %c0_i32_0 : i32, i32
  }
  func.func @transform_6(%arg0: i32) -> (i32, i32) {
    %c0_i32 = arith.constant 0 : i32
    %c0_i32_0 = arith.constant 0 : i32
    %c0_i32_1 = arith.constant 0 : i32
    return %c0_i32, %c0_i32_0 : i32, i32
  }
  func.func @transform_7(%arg0: i32) -> (i32, i32) {
    %c0_i32 = arith.constant 0 : i32
    %c0_i32_0 = arith.constant 0 : i32
    %c0_i32_1 = arith.constant 0 : i32
    return %c0_i32, %c0_i32_0 : i32, i32
  }
  func.func @transform_8(%arg0: i32) -> (i32, i32) {
    %c0_i32 = arith.constant 0 : i32
    %c0_i32_0 = arith.constant 0 : i32
    %c0_i32_1 = arith.constant 0 : i32
    return %c0_i32, %c0_i32_0 : i32, i32
  }
  func.func @transform_9(%arg0: i32) -> (i32, i32) {
    %c0_i32 = arith.constant 0 : i32
    %c0_i32_0 = arith.constant 0 : i32
    return %arg0, %c0_i32 : i32, i32
  }
}

</mosaic_0001>

<bundles_post_ra>
// kernel: tpu_custom_call.1
= control target key start
LH: loop header
LB: loop body
LE: loop exit
PB: predicated region body
PF: predicated region fallthrough
CT: control target
= control target key end

     0   :  { %s1110_s11 = smov 0   ;;  %s1330_s0 = inlined_call_operand.vmem [shape: f32[256,8], index: 0, kind: input, shape index: {}]   ;;  %s1331_s1 = inlined_call_operand.vmem [shape: f32[256,4], index: 1, kind: input, shape index: {}]   ;;  %s1332_s2 = inlined_call_operand.vmem [shape: bf16[8,128], index: 2, kind: input, shape index: {}]   ;;  %s1333_s3 = inlined_call_operand.vmem [shape: bf16[4,128], index: 3, kind: input, shape index: {}]   ;;  %s1334_s4 = inlined_call_operand.vmem [shape: f32[1,128], index: 4, kind: input, shape index: {}]   ;;  %s1335_s5 = inlined_call_operand.vmem [shape: bf16[128,128], index: 5, kind: input, shape index: {}]   ;;  %s1336_s6 = inlined_call_operand.vmem [shape: f32[1,128], index: 6, kind: input, shape index: {}]   ;;  %s1337_s7 = inlined_call_operand.vmem [shape: bf16[1,128], index: 7, kind: input, shape index: {}]   ;;  %s1338_s8 = inlined_call_operand.<no memory space> [shape: f32[1,1], index: 8, kind: input, shape index: {}]   ;;  %s1339_s9 = inlined_call_operand.vmem [shape: f32[256,1], index: 9, kind: output, shape index: {}]  }
   0x1   :  { %v14_v0 = vstv %s1338_s8 }
   0x2   :  { %15 = vst [vmem:[#allocation2] sm:$0x1] %v14_v0 }
   0x3 LB: > { %s937_s12 = sadd.s32 4294967295, %s1055_s11   ;;  %p941_p0 = scmp.ge.s32.totalorder %s1055_s11, 1  ;;  %s1055_s11 = sphi %s1110_s11, %s21_s11  }
   0x4   : > { %p301_p1 = scmp.lt.s32.totalorder %s1055_s11, 3 }
   0x6   : > { %p302_p2 = pnand %p941_p0, %p301_p1 }
   0x7   : > { %s942_s16 = sshll.u32 (!%p302_p2), %s937_s12, 4 }
   0x8   : > { %305 = sbr.rel (%p302_p2) target bundleno = 527 (0x20f), region = 56  ;;  %p343_p3 = scmp.lt.s32.totalorder (!%p302_p2), %s942_s16, 31 }
   0xd   : > { %v362_v1 = vld [vmem:[%s1333_s3] sm:$0x3]  ;;  %vm479_vm0 = vcmask 1043456   ;;  %s1341_s16 = smov (!%p343_p3, %s942_s16), 31  ;;  %vm430_vm1 = vcmask 31744   ;;  %vm548_vm2 = vcmask 64512  }
   0xe   : > { %v360_v2 = vld [vmem:[%s1332_s2] sm:$0xf]  ;;  %v363_v3 = vunpack.c.l.bf16 %v362_v1  ;;  %s1124_s17 = sshll.u32 %s1341_s16, 3  ;;  %v1021_v23 = vld [vmem:[%s1335_s5 + $0x38] sm:$0xff]   ;;  %v1020_v28 = vld [vmem:[%s1335_s5 + $0x30] sm:$0xff]   ;;  %vm852_vm3 = vcmask 7168  }
   0xf   : > { %v361_v4 = vunpack.c.l.bf16 %v360_v2  ;;  %s1130_s20 = scalar_lea.vmem %s1331_s1, %s1124_s17  ;;  %s1136_s23 = scalar_lea.vmem %s1330_s0, %s1124_s17  ;;  %v1014_v24 = vunpack.c.h.bf16 %v1021_v23  ;;  %v1013_v25 = vunpack.c.l.bf16 %v1021_v23  ;;  %v1010_v29 = vunpack.c.h.bf16 %v1020_v28  ;;  %v1019_v31 = vld [vmem:[%s1335_s5 + $0x28] sm:$0xff]   ;;  %v1018_v36 = vld [vmem:[%s1335_s5 + $0x20] sm:$0xff]   ;;  %v1017_v39 = vld [vmem:[%s1335_s5 + $0x18] sm:$0xff]  }
  0x10   : > { %948 = vmatpush.msk.msra.mxu0 %vm479_vm0, %v363_v3  ;;  %v414_v5 = vld [vmem:[%s1130_s20] sm:$0xff]  ;;  %v415_v7 = vld [vmem:[%s1130_s20 + $0x8] sm:$0xff]  ;;  %v416_v9 = vld [vmem:[%s1130_s20 + $0x10] sm:$0xff]  ;;  %v1009_v30 = vunpack.c.l.bf16 %v1020_v28  ;;  %v1006_v32 = vunpack.c.h.bf16 %v1019_v31  ;;  %v1005_v33 = vunpack.c.l.bf16 %v1019_v31  ;;  %v1002_v37 = vunpack.c.h.bf16 %v1018_v36  ;;  %s1292_s28 = scalar_lea.vmem %s1339_s9, %s1124_s17 }
  0x11   : > { %612 = vmatpush.msra.mxu1 %v361_v4  ;;  %v398_v6 = vld [vmem:[%s1136_s23] sm:$0xff]  ;;  %949 = vmatmul.msk.f32.vlgmr.msra.gmra.mxu0 %vm430_vm1, %v414_v5  ;;  %v399_v8 = vld [vmem:[%s1136_s23 + $0x8] sm:$0xff]  ;;  %v400_v10 = vld [vmem:[%s1136_s23 + $0x10] sm:$0xff]  ;;  %v1001_v38 = vunpack.c.l.bf16 %v1018_v36  ;;  %v998_v40 = vunpack.c.h.bf16 %v1017_v39  ;;  %v997_v41 = vunpack.c.l.bf16 %v1017_v39 }
  0x12   : > { %965 = vmatmul.msk.f32.vlgmr.msra.gmra.mxu1 %vm548_vm2, %v398_v6  ;;  %v417_v11 = vld [vmem:[%s1130_s20 + $0x18] sm:$0xff]  ;;  %v418_v13 = vld [vmem:[%s1130_s20 + $0x20] sm:$0xff]  ;;  %v419_v15 = vld [vmem:[%s1130_s20 + $0x28] sm:$0xff]  ;;  %702 = vmatpush.msra.mxu2 %v1014_v24 }
  0x13   : > { %v401_v12 = vld [vmem:[%s1136_s23 + $0x18] sm:$0xff]  ;;  %v402_v14 = vld [vmem:[%s1136_s23 + $0x20] sm:$0xff]  ;;  %v403_v16 = vld [vmem:[%s1136_s23 + $0x28] sm:$0xff]  ;;  %1022 = vmatpush.msra.mxu3 %v1014_v24 }
  0x14   : > { %v420_v17 = vld [vmem:[%s1130_s20 + $0x30] sm:$0xff]  ;;  %v421_v19 = vld [vmem:[%s1130_s20 + $0x38] sm:$0xff]  ;;  %v422_v21 = vld [vmem:[%s1130_s20 + $0x40] sm:$0xff]  ;;  %703 = vmatpush.msra.mxu2 %v1013_v25 }
  0x15   : > { %v404_v18 = vld [vmem:[%s1136_s23 + $0x30] sm:$0xff]  ;;  %v405_v20 = vld [vmem:[%s1136_s23 + $0x38] sm:$0xff]  ;;  %v406_v22 = vld [vmem:[%s1136_s23 + $0x40] sm:$0xff]  ;;  %1023 = vmatpush.msra.mxu3 %v1013_v25 }
  0x16   : > { %v423_v26 = vld [vmem:[%s1130_s20 + $0x48] sm:$0xff]  ;;  %704 = vmatpush.msra.mxu2 %v1010_v29  ;;  %v424_v34 = vld [vmem:[%s1130_s20 + $0x50] sm:$0xff]  ;;  %v425_v42 = vld [vmem:[%s1130_s20 + $0x58] sm:$0xff] }
  0x17   : > { %v407_v27 = vld [vmem:[%s1136_s23 + $0x48] sm:$0xff]  ;;  %1024 = vmatpush.msra.mxu3 %v1010_v29  ;;  %v408_v35 = vld [vmem:[%s1136_s23 + $0x50] sm:$0xff]  ;;  %v409_v43 = vld [vmem:[%s1136_s23 + $0x58] sm:$0xff] }
  0x18   : > { %705 = vmatpush.msra.mxu2 %v1009_v30  ;;  %v1016_v44 = vld [vmem:[%s1335_s5 + $0x10] sm:$0xff]   ;;  %v1015_v47 = vld [vmem:[%s1335_s5 + $0x8] sm:$0xff]   ;;  %v426_v49 = vld [vmem:[%s1130_s20 + $0x60] sm:$0xff] }
  0x19   : > { %950 = vmatmul.msk.f32.gmra.mxu0 %vm430_vm1, %v415_v7  ;;  %1025 = vmatpush.msra.mxu3 %v1009_v30  ;;  %v994_v45 = vunpack.c.h.bf16 %v1016_v44  ;;  %v993_v46 = vunpack.c.l.bf16 %v1016_v44  ;;  %v990_v48 = vunpack.c.h.bf16 %v1015_v47  ;;  %v410_v50 = vld [vmem:[%s1136_s23 + $0x60] sm:$0xff]  ;;  %v989_v51 = vunpack.c.l.bf16 %v1015_v47  ;;  %v427_v55 = vld [vmem:[%s1130_s20 + $0x68] sm:$0xff]  ;;  %v428_v57 = vld [vmem:[%s1130_s20 + $0x70] sm:$0xff] }
  0x1a   : > { %966 = vmatmul.msk.f32.gmra.mxu1 %vm548_vm2, %v399_v8  ;;  %706 = vmatpush.msra.mxu2 %v1006_v32  ;;  %v984_v52 = vld [vmem:[%s1335_s5] sm:$0xff]   ;;  %v411_v56 = vld [vmem:[%s1136_s23 + $0x68] sm:$0xff]  ;;  %v412_v58 = vld [vmem:[%s1136_s23 + $0x70] sm:$0xff] }
  0x1b   : > { %1026 = vmatpush.msra.mxu3 %v1006_v32  ;;  %v986_v53 = vunpack.c.h.bf16 %v984_v52  ;;  %v985_v54 = vunpack.c.l.bf16 %v984_v52  ;;  %v429_v59 = vld [vmem:[%s1130_s20 + $0x78] sm:$0xff]  ;;  %v1229_v61 = vld [vmem:[%s1334_s4] ss:$0 sm:$0xff] }
  0x1c   : > { %707 = vmatpush.msra.mxu2 %v1005_v33  ;;  %v413_v60 = vld [vmem:[%s1136_s23 + $0x78] sm:$0xff] }
  0x1d   : > { %1027 = vmatpush.msra.mxu3 %v1005_v33 }
  0x1e   : > { %708 = vmatpush.msra.mxu2 %v1002_v37 }
  0x1f   : > { %1028 = vmatpush.msra.mxu3 %v1002_v37 }
  0x20   : > { %709 = vmatpush.msra.mxu2 %v1001_v38 }
  0x21   : > { %951 = vmatmul.msk.f32.gmra.mxu0 %vm430_vm1, %v416_v9  ;;  %1029 = vmatpush.msra.mxu3 %v1001_v38 }
  0x22   : > { %967 = vmatmul.msk.f32.gmra.mxu1 %vm548_vm2, %v400_v10  ;;  %710 = vmatpush.msra.mxu2 %v998_v40 }
  0x23   : > { %1030 = vmatpush.msra.mxu3 %v998_v40 }
  0x24   : > { %711 = vmatpush.msra.mxu2 %v997_v41 }
  0x25   : > { %1031 = vmatpush.msra.mxu3 %v997_v41 }
  0x26   : > { %712 = vmatpush.msra.mxu2 %v994_v45 }
  0x27   : > { %1032 = vmatpush.msra.mxu3 %v994_v45 }
  0x28   : > { %713 = vmatpush.msra.mxu2 %v993_v46 }
  0x29   : > { %952 = vmatmul.msk.f32.gmra.mxu0 %vm430_vm1, %v417_v11  ;;  %1033 = vmatpush.msra.mxu3 %v993_v46 }
  0x2a   : > { %968 = vmatmul.msk.f32.gmra.mxu1 %vm548_vm2, %v401_v12  ;;  %714 = vmatpush.msra.mxu2 %v990_v48 }
  0x2b   : > { %1034 = vmatpush.msra.mxu3 %v990_v48 }
  0x2c   : > { %715 = vmatpush.msra.mxu2 %v989_v51 }
  0x2d   : > { %1035 = vmatpush.msra.mxu3 %v989_v51 }
  0x2e   : > { %716 = vmatpush.msra.mxu2 %v986_v53 }
  0x2f   : > { %1036 = vmatpush.msra.mxu3 %v986_v53 }
  0x30   : > { %717 = vmatpush.msra.mxu2 %v985_v54 }
  0x31   : > { %953 = vmatmul.msk.f32.gmra.mxu0 %vm430_vm1, %v418_v13  ;;  %1037 = vmatpush.msra.mxu3 %v985_v54 }
  0x32   : > { %969 = vmatmul.msk.f32.gmra.mxu1 %vm548_vm2, %v402_v14 }
  0x39   : > { %954 = vmatmul.msk.f32.gmra.mxu0 %vm430_vm1, %v419_v15 }
  0x3a   : > { %970 = vmatmul.msk.f32.gmra.mxu1 %vm548_vm2, %v403_v16 }
  0x41   : > { %955 = vmatmul.msk.f32.gmra.mxu0 %vm430_vm1, %v420_v17 }
  0x42   : > { %971 = vmatmul.msk.f32.gmra.mxu1 %vm548_vm2, %v404_v18 }
  0x49   : > { %956 = vmatmul.msk.f32.gmra.mxu0 %vm430_vm1, %v421_v19 }
  0x4a   : > { %972 = vmatmul.msk.f32.gmra.mxu1 %vm548_vm2, %v405_v20 }
  0x51   : > { %957 = vmatmul.msk.f32.gmra.mxu0 %vm430_vm1, %v422_v21 }
  0x52   : > { %973 = vmatmul.msk.f32.gmra.mxu1 %vm548_vm2, %v406_v22 }
  0x59   : > { %958 = vmatmul.msk.f32.gmra.mxu0 %vm430_vm1, %v423_v26 }
  0x5a   : > { %974 = vmatmul.msk.f32.gmra.mxu1 %vm548_vm2, %v407_v27 }
  0x61   : > { %959 = vmatmul.msk.f32.gmra.mxu0 %vm430_vm1, %v424_v34 }
  0x62   : > { %975 = vmatmul.msk.f32.gmra.mxu1 %vm548_vm2, %v408_v35 }
  0x69   : > { %960 = vmatmul.msk.f32.gmra.mxu0 %vm430_vm1, %v425_v42 }
  0x6a   : > { %976 = vmatmul.msk.f32.gmra.mxu1 %vm548_vm2, %v409_v43 }
  0x71   : > { %961 = vmatmul.msk.f32.gmra.mxu0 %vm430_vm1, %v426_v49 }
  0x72   : > { %977 = vmatmul.msk.f32.gmra.mxu1 %vm548_vm2, %v410_v50 }
  0x79   : > { %962 = vmatmul.msk.f32.gmra.mxu0 %vm430_vm1, %v427_v55 }
  0x7a   : > { %978 = vmatmul.msk.f32.gmra.mxu1 %vm548_vm2, %v411_v56 }
  0x81   : > { %963 = vmatmul.msk.f32.gmra.mxu0 %vm430_vm1, %v428_v57 }
  0x82   : > { %979 = vmatmul.msk.f32.gmra.mxu1 %vm548_vm2, %v412_v58 }
  0x89   : > { %964 = vmatmul.msk.f32.gmra.mxu0 %vm430_vm1, %v429_v59 }
  0x8a   : > { %980 = vmatmul.msk.f32.gmra.mxu1 %vm548_vm2, %v413_v60 }
  0x8e   : > { %v500_v62 = vpop.f32.mrf.mxu0 }
  0x8f   : > { %v614_v63 = vpop.f32.mrf.mxu1 }
  0x90   : > { %v615_v0 = vadd.f32 %v614_v63, %v500_v62 }
  0x92   : > { %v666_v1 = vadd.f32 %v1229_v61, %v615_v0 }
  0x94   : > { %v682_v2 = vmax.f32 %v666_v1, 0.0 }
  0x96   : > { %718 = vmatmul.f32.vlgmr.msra.gmra.mxu2 %v682_v2  ;;  %v503_v3 = vpop.f32.mrf.mxu0 }
  0x97   : > { %v617_v4 = vpop.f32.mrf.mxu1 }
  0x98   : > { %v618_v5 = vadd.f32 %v617_v4, %v503_v3 }
  0x9a   : > { %v667_v6 = vadd.f32 %v1229_v61, %v618_v5 }
  0x9c   : > { %v683_v7 = vmax.f32 %v667_v6, 0.0 }
  0x9e   : > { %721 = vmatmul.f32.gmra.mxu2 %v683_v7  ;;  %v506_v8 = vpop.f32.mrf.mxu0 }
  0x9f   : > { %v620_v9 = vpop.f32.mrf.mxu1 }
  0xa0   : > { %v621_v10 = vadd.f32 %v620_v9, %v506_v8 }
  0xa2   : > { %v668_v11 = vadd.f32 %v1229_v61, %v621_v10 }
  0xa4   : > { %v684_v12 = vmax.f32 %v668_v11, 0.0 }
  0xa6   : > { %724 = vmatmul.f32.gmra.mxu2 %v684_v12  ;;  %v509_v13 = vpop.f32.mrf.mxu0 }
  0xa7   : > { %v623_v14 = vpop.f32.mrf.mxu1 }
  0xa8   : > { %v624_v15 = vadd.f32 %v623_v14, %v509_v13 }
  0xaa   : > { %v669_v16 = vadd.f32 %v1229_v61, %v624_v15  ;;  %v396_v15 = vld [vmem:[%s1337_s7] sm:$0x1] }
  0xac   : > { %v685_v17 = vmax.f32 %v669_v16, 0.0  ;;  %v1253_v16 = vld [vmem:[%s1336_s6] ss:$0 sm:$0xff] }
  0xae   : > { %727 = vmatmul.f32.gmra.mxu2 %v685_v17  ;;  %v512_v18 = vpop.f32.mrf.mxu0  ;;  %v397_v17 = vunpack.c.l.bf16 %v396_v15  ;;  %v1048_v15 = vld [vmem:[#allocation2] ss:$0 sm:$0xff] }
  0xaf   : > { %v626_v19 = vpop.f32.mrf.mxu1 }
  0xb0   : > { %v627_v20 = vadd.f32 %v626_v19, %v512_v18 }
  0xb2   : > { %v670_v21 = vadd.f32 %v1229_v61, %v627_v20  ;;  %v1256_v20 = vperm.slane %v397_v17, 0 }
  0xb4   : > { %v686_v22 = vmax.f32 %v670_v21, 0.0 }
  0xb6   : > { %730 = vmatmul.f32.gmra.mxu2 %v686_v22  ;;  %v515_v23 = vpop.f32.mrf.mxu0 }
  0xb7   : > { %v629_v24 = vpop.f32.mrf.mxu1 }
  0xb8   : > { %v630_v25 = vadd.f32 %v629_v24, %v515_v23 }
  0xba   : > { %v671_v26 = vadd.f32 %v1229_v61, %v630_v25 }
  0xbc   : > { %v687_v27 = vmax.f32 %v671_v26, 0.0 }
  0xbe   : > { %733 = vmatmul.f32.gmra.mxu2 %v687_v27  ;;  %v518_v28 = vpop.f32.mrf.mxu0 }
  0xbf   : > { %v632_v29 = vpop.f32.mrf.mxu1 }
  0xc0   : > { %v633_v30 = vadd.f32 %v632_v29, %v518_v28 }
  0xc2   : > { %v672_v31 = vadd.f32 %v1229_v61, %v633_v30 }
  0xc4   : > { %v688_v32 = vmax.f32 %v672_v31, 0.0 }
  0xc6   : > { %736 = vmatmul.f32.gmra.mxu2 %v688_v32  ;;  %v521_v33 = vpop.f32.mrf.mxu0 }
  0xc7   : > { %v635_v34 = vpop.f32.mrf.mxu1 }
  0xc8   : > { %v636_v35 = vadd.f32 %v635_v34, %v521_v33 }
  0xca   : > { %v673_v36 = vadd.f32 %v1229_v61, %v636_v35 }
  0xcc   : > { %v689_v37 = vmax.f32 %v673_v36, 0.0 }
  0xce   : > { %739 = vmatmul.f32.gmra.mxu2 %v689_v37  ;;  %v524_v38 = vpop.f32.mrf.mxu0 }
  0xcf   : > { %v638_v39 = vpop.f32.mrf.mxu1 }
  0xd0   : > { %v639_v40 = vadd.f32 %v638_v39, %v524_v38 }
  0xd2   : > { %v674_v41 = vadd.f32 %v1229_v61, %v639_v40 }
  0xd4   : > { %v690_v42 = vmax.f32 %v674_v41, 0.0 }
  0xd6   : > { %742 = vmatmul.f32.gmra.mxu2 %v690_v42  ;;  %v527_v43 = vpop.f32.mrf.mxu0 }
  0xd7   : > { %v641_v44 = vpop.f32.mrf.mxu1 }
  0xd8   : > { %v642_v45 = vadd.f32 %v641_v44, %v527_v43 }
  0xda   : > { %v675_v46 = vadd.f32 %v1229_v61, %v642_v45 }
  0xdc   : > { %v691_v47 = vmax.f32 %v675_v46, 0.0 }
  0xde   : > { %745 = vmatmul.f32.gmra.mxu2 %v691_v47  ;;  %v530_v48 = vpop.f32.mrf.mxu0 }
  0xdf   : > { %v644_v49 = vpop.f32.mrf.mxu1 }
  0xe0   : > { %v645_v50 = vadd.f32 %v644_v49, %v530_v48 }
  0xe2   : > { %v676_v51 = vadd.f32 %v1229_v61, %v645_v50 }
  0xe4   : > { %v692_v52 = vmax.f32 %v676_v51, 0.0 }
  0xe6   : > { %748 = vmatmul.f32.gmra.mxu2 %v692_v52  ;;  %v533_v53 = vpop.f32.mrf.mxu0 }
  0xe7   : > { %v647_v54 = vpop.f32.mrf.mxu1 }
  0xe8   : > { %v648_v55 = vadd.f32 %v647_v54, %v533_v53 }
  0xea   : > { %v677_v56 = vadd.f32 %v1229_v61, %v648_v55 }
  0xec   : > { %v693_v57 = vmax.f32 %v677_v56, 0.0 }
  0xee   : > { %751 = vmatmul.f32.vlgmr.msra.gmra.mxu3 %v693_v57  ;;  %v536_v58 = vpop.f32.mrf.mxu0 }
  0xef   : > { %v650_v59 = vpop.f32.mrf.mxu1 }
  0xf0   : > { %v651_v60 = vadd.f32 %v650_v59, %v536_v58 }
  0xf2   : > { %v678_v62 = vadd.f32 %v1229_v61, %v651_v60 }
  0xf4   : > { %v694_v63 = vmax.f32 %v678_v62, 0.0 }
  0xf6   : > { %754 = vmatmul.f32.gmra.mxu3 %v694_v63  ;;  %v539_v0 = vpop.f32.mrf.mxu0 }
  0xf7   : > { %v653_v1 = vpop.f32.mrf.mxu1 }
  0xf8   : > { %v654_v2 = vadd.f32 %v653_v1, %v539_v0 }
  0xfa   : > { %v679_v3 = vadd.f32 %v1229_v61, %v654_v2 }
  0xfc   : > { %v695_v4 = vmax.f32 %v679_v3, 0.0 }
  0xfe   : > { %757 = vmatmul.f32.gmra.mxu3 %v695_v4  ;;  %v542_v5 = vpop.f32.mrf.mxu0 }
  0xff   : > { %v656_v6 = vpop.f32.mrf.mxu1 }
 0x100   : > { %v657_v7 = vadd.f32 %v656_v6, %v542_v5 }
 0x102   : > { %v680_v8 = vadd.f32 %v1229_v61, %v657_v7 }
 0x104   : > { %v696_v9 = vmax.f32 %v680_v8, 0.0 }
 0x106   : > { %760 = vmatmul.f32.gmra.mxu3 %v696_v9  ;;  %v545_v10 = vpop.f32.mrf.mxu0 }
 0x107   : > { %v659_v11 = vpop.f32.mrf.mxu1 }
 0x108   : > { %v660_v12 = vadd.f32 %v659_v11, %v545_v10 }
 0x10a   : > { %v681_v13 = vadd.f32 %v1229_v61, %v660_v12 }
 0x10c   : > { %v697_v14 = vmax.f32 %v681_v13, 0.0 }
 0x10e   : > { %763 = vmatmul.f32.gmra.mxu3 %v697_v14 }
 0x119   : > { %v719_v18 = vpop.f32.mrf.mxu2 }
 0x11a   : > { %v720_v19 = vadd.f32 %v1253_v16, %v719_v18 }
 0x11c   : > { %v767_v21 = vmax.f32 %v720_v19, 0.0 }
 0x11e   : > { %v784_v61 = vmul.f32 %v1256_v20, %v767_v21 }
 0x120   : > { %800 = vadd.xlane.f32.xlu0 %v784_v61 }
 0x121   : > { %v722_v22 = vpop.f32.mrf.mxu2 }
 0x122   : > { %v723_v23 = vadd.f32 %v1253_v16, %v722_v22 }
 0x124   : > { %v768_v24 = vmax.f32 %v723_v23, 0.0 }
 0x126   : > { %v785_v25 = vmul.f32 %v1256_v20, %v768_v24 }
 0x128   : > { %802 = vadd.xlane.f32.xlu0 %v785_v25 }
 0x129   : > { %v725_v26 = vpop.f32.mrf.mxu2 }
 0x12a   : > { %v726_v27 = vadd.f32 %v1253_v16, %v725_v26 }
 0x12c   : > { %v769_v28 = vmax.f32 %v726_v27, 0.0 }
 0x12e   : > { %v786_v29 = vmul.f32 %v1256_v20, %v769_v28 }
 0x130   : > { %804 = vadd.xlane.f32.xlu1 %v786_v29 }
 0x131   : > { %v728_v30 = vpop.f32.mrf.mxu2 }
 0x132   : > { %v729_v31 = vadd.f32 %v1253_v16, %v728_v30 }
 0x134   : > { %v770_v32 = vmax.f32 %v729_v31, 0.0 }
 0x136   : > { %v787_v33 = vmul.f32 %v1256_v20, %v770_v32 }
 0x138   : > { %806 = vadd.xlane.f32.xlu1 %v787_v33 }
 0x139   : > { %v731_v34 = vpop.f32.mrf.mxu2 }
 0x13a   : > { %v732_v35 = vadd.f32 %v1253_v16, %v731_v34 }
 0x13c   : > { %v771_v36 = vmax.f32 %v732_v35, 0.0 }
 0x13e   : > { %v788_v37 = vmul.f32 %v1256_v20, %v771_v36 }
 0x140   : > { %808 = vadd.xlane.f32.xlu2 %v788_v37 }
 0x141   : > { %v734_v38 = vpop.f32.mrf.mxu2 }
 0x142   : > { %v735_v39 = vadd.f32 %v1253_v16, %v734_v38 }
 0x144   : > { %v772_v40 = vmax.f32 %v735_v39, 0.0 }
 0x146   : > { %v789_v41 = vmul.f32 %v1256_v20, %v772_v40 }
 0x148   : > { %810 = vadd.xlane.f32.xlu2 %v789_v41 }
 0x149   : > { %v737_v42 = vpop.f32.mrf.mxu2 }
 0x14a   : > { %v738_v43 = vadd.f32 %v1253_v16, %v737_v42 }
 0x14c   : > { %v773_v44 = vmax.f32 %v738_v43, 0.0 }
 0x14e   : > { %v790_v45 = vmul.f32 %v1256_v20, %v773_v44 }
 0x150   : > { %812 = vadd.xlane.f32.xlu0 %v790_v45 }
 0x151   : > { %v740_v46 = vpop.f32.mrf.mxu2 }
 0x152   : > { %v741_v47 = vadd.f32 %v1253_v16, %v740_v46 }
 0x154   : > { %v774_v48 = vmax.f32 %v741_v47, 0.0 }
 0x156   : > { %v791_v49 = vmul.f32 %v1256_v20, %v774_v48 }
 0x158   : > { %814 = vadd.xlane.f32.xlu1 %v791_v49 }
 0x159   : > { %v743_v50 = vpop.f32.mrf.mxu2 }
 0x15a   : > { %v744_v51 = vadd.f32 %v1253_v16, %v743_v50 }
 0x15c   : > { %v775_v52 = vmax.f32 %v744_v51, 0.0 }
 0x15e   : > { %v792_v53 = vmul.f32 %v1256_v20, %v775_v52 }
 0x160   : > { %816 = vadd.xlane.f32.xlu2 %v792_v53 }
 0x161   : > { %v746_v54 = vpop.f32.mrf.mxu2 }
 0x162   : > { %v747_v55 = vadd.f32 %v1253_v16, %v746_v54 }
 0x164   : > { %v776_v56 = vmax.f32 %v747_v55, 0.0 }
 0x166   : > { %v793_v57 = vmul.f32 %v1256_v20, %v776_v56 }
 0x168   : > { %818 = vadd.xlane.f32.xlu0 %v793_v57 }
 0x169   : > { %v749_v58 = vpop.f32.mrf.mxu2 }
 0x16a   : > { %v750_v59 = vadd.f32 %v1253_v16, %v749_v58 }
 0x16c   : > { %v777_v60 = vmax.f32 %v750_v59, 0.0 }
 0x16e   : > { %v794_v62 = vmul.f32 %v1256_v20, %v777_v60 }
 0x170   : > { %820 = vadd.xlane.f32.xlu1 %v794_v62 }
 0x171   : > { %v752_v63 = vpop.f32.mrf.mxu3 }
 0x172   : > { %v753_v0 = vadd.f32 %v1253_v16, %v752_v63 }
 0x174   : > { %v778_v1 = vmax.f32 %v753_v0, 0.0 }
 0x176   : > { %v795_v2 = vmul.f32 %v1256_v20, %v778_v1 }
 0x178   : > { %822 = vadd.xlane.f32.xlu2 %v795_v2 }
 0x179   : > { %v755_v3 = vpop.f32.mrf.mxu3 }
 0x17a   : > { %v756_v4 = vadd.f32 %v1253_v16, %v755_v3 }
 0x17c   : > { %v779_v5 = vmax.f32 %v756_v4, 0.0 }
 0x17e   : > { %v796_v6 = vmul.f32 %v1256_v20, %v779_v5 }
 0x180   : > { %824 = vadd.xlane.f32.xlu0 %v796_v6 }
 0x181   : > { %v758_v7 = vpop.f32.mrf.mxu3 }
 0x182   : > { %v759_v8 = vadd.f32 %v1253_v16, %v758_v7 }
 0x184   : > { %v780_v9 = vmax.f32 %v759_v8, 0.0 }
 0x186   : > { %v797_v10 = vmul.f32 %v1256_v20, %v780_v9 }
 0x188   : > { %826 = vadd.xlane.f32.xlu1 %v797_v10 }
 0x189   : > { %v761_v11 = vpop.f32.mrf.mxu3 }
 0x18a   : > { %v762_v12 = vadd.f32 %v1253_v16, %v761_v11 }
 0x18c   : > { %v781_v13 = vmax.f32 %v762_v12, 0.0 }
 0x18e   : > { %v798_v14 = vmul.f32 %v1256_v20, %v781_v13 }
 0x190   : > { %828 = vadd.xlane.f32.xlu2 %v798_v14 }
 0x191   : > { %v764_v17 = vpop.f32.mrf.mxu3 }
 0x192   : > { %v765_v18 = vadd.f32 %v1253_v16, %v764_v17 }
 0x193   : > { %v801_v19 = vpop.xlane.xlu0 %800 }
 0x194   : > { %v782_v21 = vmax.f32 %v765_v18, 0.0  ;;  %v836_v61 = vadd.f32 %v1048_v15, %v801_v19 }
 0x196   : > { %853 = vst.msk [vmem:[%s1292_s28] sm:$0xff] %vm852_vm3, %v836_v61  ;;  %v799_v22 = vmul.f32 %v1256_v20, %v782_v21 }
 0x198   : > { %830 = vadd.xlane.f32.xlu0 %v799_v22 }
 0x19b   : > { %v803_v16 = vpop.xlane.xlu0 %802 }
 0x19c   : > { %v837_v23 = vadd.f32 %v1048_v15, %v803_v16 }
 0x19e   : > { %854 = vst.msk [vmem:[%s1292_s28 + $0x8] sm:$0xff] %vm852_vm3, %v837_v23 }
 0x1a3   : > { %v805_v24 = vpop.xlane.xlu1 %804 }
 0x1a4   : > { %v838_v25 = vadd.f32 %v1048_v15, %v805_v24 }
 0x1a6   : > { %855 = vst.msk [vmem:[%s1292_s28 + $0x10] sm:$0xff] %vm852_vm3, %v838_v25 }
 0x1ab   : > { %v807_v26 = vpop.xlane.xlu1 %806 }
 0x1ac   : > { %v839_v27 = vadd.f32 %v1048_v15, %v807_v26 }
 0x1ae   : > { %856 = vst.msk [vmem:[%s1292_s28 + $0x18] sm:$0xff] %vm852_vm3, %v839_v27 }
 0x1b3   : > { %v809_v28 = vpop.xlane.xlu2 %808 }
 0x1b4   : > { %v840_v29 = vadd.f32 %v1048_v15, %v809_v28 }
 0x1b6   : > { %857 = vst.msk [vmem:[%s1292_s28 + $0x20] sm:$0xff] %vm852_vm3, %v840_v29 }
 0x1bb   : > { %v811_v20 = vpop.xlane.xlu2 %810 }
 0x1bc   : > { %v841_v30 = vadd.f32 %v1048_v15, %v811_v20 }
 0x1be   : > { %858 = vst.msk [vmem:[%s1292_s28 + $0x28] sm:$0xff] %vm852_vm3, %v841_v30 }
 0x1c3   : > { %v813_v31 = vpop.xlane.xlu0 %812 }
 0x1c4   : > { %v842_v32 = vadd.f32 %v1048_v15, %v813_v31 }
 0x1c6   : > { %859 = vst.msk [vmem:[%s1292_s28 + $0x30] sm:$0xff] %vm852_vm3, %v842_v32 }
 0x1cb   : > { %v815_v33 = vpop.xlane.xlu1 %814 }
 0x1cc   : > { %v843_v34 = vadd.f32 %v1048_v15, %v815_v33 }
 0x1ce   : > { %860 = vst.msk [vmem:[%s1292_s28 + $0x38] sm:$0xff] %vm852_vm3, %v843_v34 }
 0x1d3   : > { %v817_v35 = vpop.xlane.xlu2 %816 }
 0x1d4   : > { %v844_v36 = vadd.f32 %v1048_v15, %v817_v35 }
 0x1d6   : > { %861 = vst.msk [vmem:[%s1292_s28 + $0x40] sm:$0xff] %vm852_vm3, %v844_v36 }
 0x1db   : > { %v819_v37 = vpop.xlane.xlu0 %818 }
 0x1dc   : > { %v845_v38 = vadd.f32 %v1048_v15, %v819_v37 }
 0x1de   : > { %862 = vst.msk [vmem:[%s1292_s28 + $0x48] sm:$0xff] %vm852_vm3, %v845_v38 }
 0x1e3   : > { %v821_v39 = vpop.xlane.xlu1 %820 }
 0x1e4   : > { %v846_v40 = vadd.f32 %v1048_v15, %v821_v39 }
 0x1e6   : > { %863 = vst.msk [vmem:[%s1292_s28 + $0x50] sm:$0xff] %vm852_vm3, %v846_v40 }
 0x1eb   : > { %v823_v41 = vpop.xlane.xlu2 %822 }
 0x1ec   : > { %v847_v42 = vadd.f32 %v1048_v15, %v823_v41 }
 0x1ee   : > { %864 = vst.msk [vmem:[%s1292_s28 + $0x58] sm:$0xff] %vm852_vm3, %v847_v42 }
 0x1f3   : > { %v825_v43 = vpop.xlane.xlu0 %824 }
 0x1f4   : > { %v848_v44 = vadd.f32 %v1048_v15, %v825_v43 }
 0x1f6   : > { %865 = vst.msk [vmem:[%s1292_s28 + $0x60] sm:$0xff] %vm852_vm3, %v848_v44 }
 0x1fb   : > { %v827_v45 = vpop.xlane.xlu1 %826 }
 0x1fc   : > { %v849_v46 = vadd.f32 %v1048_v15, %v827_v45 }
 0x1fe   : > { %866 = vst.msk [vmem:[%s1292_s28 + $0x68] sm:$0xff] %vm852_vm3, %v849_v46 }
 0x203   : > { %v829_v47 = vpop.xlane.xlu2 %828 }
 0x204   : > { %v850_v48 = vadd.f32 %v1048_v15, %v829_v47 }
 0x206   : > { %867 = vst.msk [vmem:[%s1292_s28 + $0x70] sm:$0xff] %vm852_vm3, %v850_v48 }
 0x20b   : > { %v831_v49 = vpop.xlane.xlu0 %830 }
 0x20c   : > { %v851_v50 = vadd.f32 %v1048_v15, %v831_v49 }
 0x20e   : > { %868 = vst.msk [vmem:[%s1292_s28 + $0x78] sm:$0xff] %vm852_vm3, %v851_v50 }
 0x20f PF: > { %s21_s11 = sadd.s32 1, %s1055_s11  }
 0x210   : > { %p18_p4 = scmp.ge.s32.totalorder %s21_s11, 4  }
 0x212   :  { %20 = sbr.rel (!%p18_p4) target bundleno = 3 (0x3), region = 89 }

</bundles_post_ra>
